<compile_context>
chip_gen: v7x
topology: tpu7x:2x2x1
jax: 0.10.0
libtpu: 0.0.40
codegen_flags: <defaults>
</compile_context>

<pallas_src>
import functools

import jax
import jax.numpy as jnp
from jax import lax
from jax.experimental import pallas as pl
from jax.experimental.pallas import tpu as pltpu


def _darts_dilconv_kernel(x_ref, dw_ref, cmask_ref, pw_ref, gamma_ref, beta_ref,
                          out_ref, *, n_batch, cin, cout, ksize, dilation, pad,
                          h, w, eps, inv_count):
    """Fused ReLU -> dilated depthwise conv -> 1x1 conv -> BatchNorm2d.

    Single grid step; the whole batch is resident in VMEM.
      x_ref     : (N*Cin, H*W + 2*base) f32, spatial flattened lane-dense and
                  zero-padded by base = pad*W + pad per side so every tap is a
                  static lane-offset load (row-OOB taps land in the zero pad).
      dw_ref    : (K*K, N*Cin, 1) f32, per-tap depthwise weight column that
                  broadcast-multiplies the whole (N*Cin, H*W) tile.
      cmask_ref : (K, H*W) f32 {0,1}, column-in-bounds mask per kw (horizontal
                  OOB taps would otherwise read the neighbouring image row).
      pw_ref    : (N*Cout, N*Cin) f32 block-diagonal pointwise weight.
      gamma/beta: (Cout, 1) f32.
      out_ref   : (N*Cout, H*W) f32 (lane-dense, unmasked full-width stores).
    """
    hw = h * w
    base = pad * w + pad

    # ---- ReLU + dilated depthwise conv, vectorized over N*Cin on sublanes ------
    acc = jnp.zeros((n_batch * cin, hw), jnp.float32)
    for kh in range(ksize):
        for kw in range(ksize):
            dh = kh * dilation - pad
            dc = kw * dilation - pad
            s = base + dh * w + dc                       # static lane offset
            xs = jnp.maximum(x_ref[:, s:s + hw], 0.0)    # ReLU (pad zeros stay 0)
            if dc != 0:                                  # horizontal halo mask
                xs = xs * cmask_ref[kw:kw + 1, :]
            acc = acc + xs * dw_ref[kh * ksize + kw]     # (N*Cin,1) broadcast FMA

    # ---- 1x1 pointwise conv: one block-diagonal MXU matmul ---------------------
    y = jnp.dot(pw_ref[...], acc,
                preferred_element_type=jnp.float32)      # (N*Cout, H*W)

    # ---- BatchNorm2d with full-batch statistics (two-pass, f32) ----------------
    row_sum = jnp.sum(y, axis=-1, keepdims=True)         # (N*Cout, 1) lane reduce
    ch_sum = row_sum[0:cout, :]
    for i in range(1, n_batch):
        ch_sum = ch_sum + row_sum[i * cout:(i + 1) * cout, :]
    mean = ch_sum * inv_count                            # (Cout, 1)

    ycs = [y[i * cout:(i + 1) * cout, :] - mean for i in range(n_batch)]
    ch_ssq = jnp.sum(ycs[0] * ycs[0], axis=-1, keepdims=True)
    for i in range(1, n_batch):
        ch_ssq = ch_ssq + jnp.sum(ycs[i] * ycs[i], axis=-1, keepdims=True)
    var = ch_ssq * inv_count                             # biased batch variance

    scale = gamma_ref[...] * lax.rsqrt(var + eps)        # (Cout, 1) tiny EUP rsqrt
    beta = beta_ref[...]
    for i in range(n_batch):
        out_ref[i * cout:(i + 1) * cout, :] = ycs[i] * scale + beta


def darts_dil_conv(x_nchw, dw_weight, pw_weight, gamma, beta,
                   kernel_size, stride, dilation, eps=1e-5):
    """x_nchw: (N, Cin, H, W); dw_weight: (Cin, 1, K, K) [torch depthwise layout];
    pw_weight: (Cout, Cin, 1, 1) [torch pointwise layout]; gamma/beta: (Cout,)."""
    n, cin, h, w = x_nchw.shape
    cout = pw_weight.shape[0]
    k = kernel_size
    pad = ((k - 1) * dilation + 1) // 2
    ho = (h + 2 * pad - dilation * (k - 1) - 1) // stride + 1
    wo = (w + 2 * pad - dilation * (k - 1) - 1) // stride + 1
    if stride != 1 or ho != h or wo != w:
        # TODO(synk): strided / non-"same" path (needs a 2-D strided tap gather).
        raise NotImplementedError("only the stride-1 'same'-conv DARTS case is fused")

    hw = h * w
    base = pad * w + pad

    # Lane-dense layout: (N, Cin, H, W) -> (N*Cin, H*W), zero-padded on the flat
    # axis so every conv tap is a static lane-offset load inside the kernel.
    x_flat = x_nchw.astype(jnp.float32).reshape(n * cin, hw)
    x_pf = jnp.pad(x_flat, ((0, 0), (base, base)))

    # Depthwise weights (Cin,1,K,K) -> per-tap (N*Cin, 1) broadcast columns.
    dw_tab = jnp.transpose(dw_weight[:, 0, :, :].reshape(cin, k * k))   # (K*K, Cin)
    dw_rows = jnp.tile(dw_tab.astype(jnp.float32), (1, n)).reshape(k * k, n * cin, 1)

    # Per-kw column-in-bounds masks (row-OOB taps already land in the zero pad).
    col = jnp.arange(hw, dtype=jnp.int32) % w
    cmask_rows = []
    for kw in range(k):
        dc = kw * dilation - pad
        lo, hi = max(0, -dc), min(w, w - dc)
        cmask_rows.append(((col >= lo) & (col < hi)).astype(jnp.float32))
    cmask = jnp.stack(cmask_rows, axis=0)                               # (K, H*W)

    # Pointwise weight (Cout,Cin,1,1) -> block-diagonal (N*Cout, N*Cin) matrix.
    pw2d = pw_weight[:, :, 0, 0].astype(jnp.float32)
    pw_bd = jnp.kron(jnp.eye(n, dtype=jnp.float32), pw2d)

    gamma2d = gamma.astype(jnp.float32).reshape(cout, 1)
    beta2d = beta.astype(jnp.float32).reshape(cout, 1)

    kernel = functools.partial(
        _darts_dilconv_kernel, n_batch=n, cin=cin, cout=cout, ksize=k,
        dilation=dilation, pad=pad, h=h, w=w, eps=eps,
        inv_count=1.0 / float(n * hw))

    vmem = pl.BlockSpec(memory_space=pltpu.MemorySpace.VMEM)
    out = pl.pallas_call(
        kernel,
        out_shape=jax.ShapeDtypeStruct((n * cout, hw), jnp.float32),
        in_specs=[vmem, vmem, vmem, vmem, vmem, vmem],
        out_specs=vmem,
    )(x_pf, dw_rows, cmask, pw_bd, gamma2d, beta2d)
    return out.reshape(n, cout, h, w)


def _reference(x_nchw, dw_weight, pw_weight, gamma, beta,
               kernel_size, stride, dilation, eps=1e-5):
    cin = x_nchw.shape[1]
    pad = ((kernel_size - 1) * dilation + 1) // 2
    x = jnp.maximum(x_nchw, 0.0)
    dn = ("NCHW", "OIHW", "NCHW")
    y = lax.conv_general_dilated(
        x, dw_weight, window_strides=(stride, stride),
        padding=[(pad, pad), (pad, pad)], rhs_dilation=(dilation, dilation),
        dimension_numbers=dn, feature_group_count=cin)
    y = lax.conv_general_dilated(
        y, pw_weight, window_strides=(1, 1), padding=[(0, 0), (0, 0)],
        dimension_numbers=dn)
    mean = jnp.mean(y, axis=(0, 2, 3), keepdims=True)
    var = jnp.mean((y - mean) ** 2, axis=(0, 2, 3), keepdims=True)
    return ((y - mean) * lax.rsqrt(var + eps)
            * gamma.reshape(1, -1, 1, 1) + beta.reshape(1, -1, 1, 1))


if __name__ == "__main__":
    # Small shapes consistent with the module: c_in=4, c_out=8, k=3, stride=1, dil=2.
    N, C_IN, H, W = 2, 4, 16, 16
    C_OUT, K, STRIDE, DIL = 8, 3, 1, 2

    key = jax.random.PRNGKey(0)
    kx, kdw, kpw, kg, kb = jax.random.split(key, 5)
    x = jax.random.normal(kx, (N, C_IN, H, W), jnp.float32)
    dw_weight = 0.1 * jax.random.normal(kdw, (C_IN, 1, K, K), jnp.float32)      # torch depthwise layout
    pw_weight = 0.1 * jax.random.normal(kpw, (C_OUT, C_IN, 1, 1), jnp.float32)  # torch pointwise layout
    gamma = 1.0 + 0.1 * jax.random.normal(kg, (C_OUT,), jnp.float32)
    beta = 0.1 * jax.random.normal(kb, (C_OUT,), jnp.float32)

    out = darts_dil_conv(x, dw_weight, pw_weight, gamma, beta, K, STRIDE, DIL)
    out = jax.block_until_ready(out)

    ref = _reference(x, dw_weight, pw_weight, gamma, beta, K, STRIDE, DIL)
    assert out.shape == (N, C_OUT, H, W), out.shape
    err = float(jnp.max(jnp.abs(out - ref)))
    assert jnp.allclose(out, ref, atol=1e-3, rtol=1e-3), err
    print("KERNEL_OK")
</pallas_src>

<mosaic_0001>
module attributes {stable_mosaic.version = 11 : i64} {
  func.func @_darts_dilconv_kernel(%arg0: memref<8x324xf32, #tpu.memory_space<vmem>>, %arg1: memref<9x8x1xf32, #tpu.memory_space<vmem>>, %arg2: memref<3x256xf32, #tpu.memory_space<vmem>>, %arg3: memref<16x8xf32, #tpu.memory_space<vmem>>, %arg4: memref<8x1xf32, #tpu.memory_space<vmem>>, %arg5: memref<8x1xf32, #tpu.memory_space<vmem>>, %arg6: memref<16x256xf32, #tpu.memory_space<vmem>>) attributes {dimension_semantics = [], scalar_prefetch = 0 : i64, scratch_operands = 0 : i64, tpu.core_type = #tpu.core_type<tc>} {
    %cst = arith.constant 0.000000e+00 : f32
    %0 = vector.broadcast %cst : f32 to vector<8x256xf32>
    %c0 = arith.constant 0 : index
    %c0_0 = arith.constant 0 : index
    %1 = vector.load %arg0[%c0, %c0_0] : memref<8x324xf32, #tpu.memory_space<vmem>>, vector<8x256xf32>
    %cst_1 = arith.constant 0.000000e+00 : f32
    %2 = vector.broadcast %cst_1 : f32 to vector<8x256xf32>
    %3 = arith.maximumf %1, %2 : vector<8x256xf32>
    %c0_2 = arith.constant 0 : index
    %c0_3 = arith.constant 0 : index
    %4 = vector.load %arg2[%c0_2, %c0_3] : memref<3x256xf32, #tpu.memory_space<vmem>>, vector<1x256xf32>
    %5 = vector.broadcast %4 : vector<1x256xf32> to vector<8x256xf32>
    %6 = arith.mulf %3, %5 : vector<8x256xf32>
    %c0_4 = arith.constant 0 : index
    %c0_5 = arith.constant 0 : index
    %c0_6 = arith.constant 0 : index
    %7 = vector.load %arg1[%c0_4, %c0_5, %c0_6] : memref<9x8x1xf32, #tpu.memory_space<vmem>>, vector<1x8x1xf32>
    %8 = vector.shape_cast %7 : vector<1x8x1xf32> to vector<8x1xf32>
    %9 = vector.broadcast %8 : vector<8x1xf32> to vector<8x256xf32>
    %10 = arith.mulf %6, %9 : vector<8x256xf32>
    %11 = arith.addf %0, %10 : vector<8x256xf32>
    %c0_7 = arith.constant 0 : index
    %c2 = arith.constant 2 : index
    %12 = vector.load %arg0[%c0_7, %c2] : memref<8x324xf32, #tpu.memory_space<vmem>>, vector<8x256xf32>
    %cst_8 = arith.constant 0.000000e+00 : f32
    %13 = vector.broadcast %cst_8 : f32 to vector<8x256xf32>
    %14 = arith.maximumf %12, %13 : vector<8x256xf32>
    %c1 = arith.constant 1 : index
    %c0_9 = arith.constant 0 : index
    %c0_10 = arith.constant 0 : index
    %15 = vector.load %arg1[%c1, %c0_9, %c0_10] : memref<9x8x1xf32, #tpu.memory_space<vmem>>, vector<1x8x1xf32>
    %16 = vector.shape_cast %15 : vector<1x8x1xf32> to vector<8x1xf32>
    %17 = vector.broadcast %16 : vector<8x1xf32> to vector<8x256xf32>
    %18 = arith.mulf %14, %17 : vector<8x256xf32>
    %19 = arith.addf %11, %18 : vector<8x256xf32>
    %c0_11 = arith.constant 0 : index
    %c4 = arith.constant 4 : index
    %20 = vector.load %arg0[%c0_11, %c4] : memref<8x324xf32, #tpu.memory_space<vmem>>, vector<8x256xf32>
    %cst_12 = arith.constant 0.000000e+00 : f32
    %21 = vector.broadcast %cst_12 : f32 to vector<8x256xf32>
    %22 = arith.maximumf %20, %21 : vector<8x256xf32>
    %c2_13 = arith.constant 2 : index
    %c0_14 = arith.constant 0 : index
    %23 = vector.load %arg2[%c2_13, %c0_14] : memref<3x256xf32, #tpu.memory_space<vmem>>, vector<1x256xf32>
    %24 = vector.broadcast %23 : vector<1x256xf32> to vector<8x256xf32>
    %25 = arith.mulf %22, %24 : vector<8x256xf32>
    %c2_15 = arith.constant 2 : index
    %c0_16 = arith.constant 0 : index
    %c0_17 = arith.constant 0 : index
    %26 = vector.load %arg1[%c2_15, %c0_16, %c0_17] : memref<9x8x1xf32, #tpu.memory_space<vmem>>, vector<1x8x1xf32>
    %27 = vector.shape_cast %26 : vector<1x8x1xf32> to vector<8x1xf32>
    %28 = vector.broadcast %27 : vector<8x1xf32> to vector<8x256xf32>
    %29 = arith.mulf %25, %28 : vector<8x256xf32>
    %30 = arith.addf %19, %29 : vector<8x256xf32>
    %c0_18 = arith.constant 0 : index
    %c32 = arith.constant 32 : index
    %31 = vector.load %arg0[%c0_18, %c32] : memref<8x324xf32, #tpu.memory_space<vmem>>, vector<8x256xf32>
    %cst_19 = arith.constant 0.000000e+00 : f32
    %32 = vector.broadcast %cst_19 : f32 to vector<8x256xf32>
    %33 = arith.maximumf %31, %32 : vector<8x256xf32>
    %c0_20 = arith.constant 0 : index
    %c0_21 = arith.constant 0 : index
    %34 = vector.load %arg2[%c0_20, %c0_21] : memref<3x256xf32, #tpu.memory_space<vmem>>, vector<1x256xf32>
    %35 = vector.broadcast %34 : vector<1x256xf32> to vector<8x256xf32>
    %36 = arith.mulf %33, %35 : vector<8x256xf32>
    %c3 = arith.constant 3 : index
    %c0_22 = arith.constant 0 : index
    %c0_23 = arith.constant 0 : index
    %37 = vector.load %arg1[%c3, %c0_22, %c0_23] : memref<9x8x1xf32, #tpu.memory_space<vmem>>, vector<1x8x1xf32>
    %38 = vector.shape_cast %37 : vector<1x8x1xf32> to vector<8x1xf32>
    %39 = vector.broadcast %38 : vector<8x1xf32> to vector<8x256xf32>
    %40 = arith.mulf %36, %39 : vector<8x256xf32>
    %41 = arith.addf %30, %40 : vector<8x256xf32>
    %c0_24 = arith.constant 0 : index
    %c34 = arith.constant 34 : index
    %42 = vector.load %arg0[%c0_24, %c34] : memref<8x324xf32, #tpu.memory_space<vmem>>, vector<8x256xf32>
    %cst_25 = arith.constant 0.000000e+00 : f32
    %43 = vector.broadcast %cst_25 : f32 to vector<8x256xf32>
    %44 = arith.maximumf %42, %43 : vector<8x256xf32>
    %c4_26 = arith.constant 4 : index
    %c0_27 = arith.constant 0 : index
    %c0_28 = arith.constant 0 : index
    %45 = vector.load %arg1[%c4_26, %c0_27, %c0_28] : memref<9x8x1xf32, #tpu.memory_space<vmem>>, vector<1x8x1xf32>
    %46 = vector.shape_cast %45 : vector<1x8x1xf32> to vector<8x1xf32>
    %47 = vector.broadcast %46 : vector<8x1xf32> to vector<8x256xf32>
    %48 = arith.mulf %44, %47 : vector<8x256xf32>
    %49 = arith.addf %41, %48 : vector<8x256xf32>
    %c0_29 = arith.constant 0 : index
    %c36 = arith.constant 36 : index
    %50 = vector.load %arg0[%c0_29, %c36] : memref<8x324xf32, #tpu.memory_space<vmem>>, vector<8x256xf32>
    %cst_30 = arith.constant 0.000000e+00 : f32
    %51 = vector.broadcast %cst_30 : f32 to vector<8x256xf32>
    %52 = arith.maximumf %50, %51 : vector<8x256xf32>
    %c2_31 = arith.constant 2 : index
    %c0_32 = arith.constant 0 : index
    %53 = vector.load %arg2[%c2_31, %c0_32] : memref<3x256xf32, #tpu.memory_space<vmem>>, vector<1x256xf32>
    %54 = vector.broadcast %53 : vector<1x256xf32> to vector<8x256xf32>
    %55 = arith.mulf %52, %54 : vector<8x256xf32>
    %c5 = arith.constant 5 : index
    %c0_33 = arith.constant 0 : index
    %c0_34 = arith.constant 0 : index
    %56 = vector.load %arg1[%c5, %c0_33, %c0_34] : memref<9x8x1xf32, #tpu.memory_space<vmem>>, vector<1x8x1xf32>
    %57 = vector.shape_cast %56 : vector<1x8x1xf32> to vector<8x1xf32>
    %58 = vector.broadcast %57 : vector<8x1xf32> to vector<8x256xf32>
    %59 = arith.mulf %55, %58 : vector<8x256xf32>
    %60 = arith.addf %49, %59 : vector<8x256xf32>
    %c0_35 = arith.constant 0 : index
    %c64 = arith.constant 64 : index
    %61 = vector.load %arg0[%c0_35, %c64] : memref<8x324xf32, #tpu.memory_space<vmem>>, vector<8x256xf32>
    %cst_36 = arith.constant 0.000000e+00 : f32
    %62 = vector.broadcast %cst_36 : f32 to vector<8x256xf32>
    %63 = arith.maximumf %61, %62 : vector<8x256xf32>
    %c0_37 = arith.constant 0 : index
    %c0_38 = arith.constant 0 : index
    %64 = vector.load %arg2[%c0_37, %c0_38] : memref<3x256xf32, #tpu.memory_space<vmem>>, vector<1x256xf32>
    %65 = vector.broadcast %64 : vector<1x256xf32> to vector<8x256xf32>
    %66 = arith.mulf %63, %65 : vector<8x256xf32>
    %c6 = arith.constant 6 : index
    %c0_39 = arith.constant 0 : index
    %c0_40 = arith.constant 0 : index
    %67 = vector.load %arg1[%c6, %c0_39, %c0_40] : memref<9x8x1xf32, #tpu.memory_space<vmem>>, vector<1x8x1xf32>
    %68 = vector.shape_cast %67 : vector<1x8x1xf32> to vector<8x1xf32>
    %69 = vector.broadcast %68 : vector<8x1xf32> to vector<8x256xf32>
    %70 = arith.mulf %66, %69 : vector<8x256xf32>
    %71 = arith.addf %60, %70 : vector<8x256xf32>
    %c0_41 = arith.constant 0 : index
    %c66 = arith.constant 66 : index
    %72 = vector.load %arg0[%c0_41, %c66] : memref<8x324xf32, #tpu.memory_space<vmem>>, vector<8x256xf32>
    %cst_42 = arith.constant 0.000000e+00 : f32
    %73 = vector.broadcast %cst_42 : f32 to vector<8x256xf32>
    %74 = arith.maximumf %72, %73 : vector<8x256xf32>
    %c7 = arith.constant 7 : index
    %c0_43 = arith.constant 0 : index
    %c0_44 = arith.constant 0 : index
    %75 = vector.load %arg1[%c7, %c0_43, %c0_44] : memref<9x8x1xf32, #tpu.memory_space<vmem>>, vector<1x8x1xf32>
    %76 = vector.shape_cast %75 : vector<1x8x1xf32> to vector<8x1xf32>
    %77 = vector.broadcast %76 : vector<8x1xf32> to vector<8x256xf32>
    %78 = arith.mulf %74, %77 : vector<8x256xf32>
    %79 = arith.addf %71, %78 : vector<8x256xf32>
    %c0_45 = arith.constant 0 : index
    %c68 = arith.constant 68 : index
    %80 = vector.load %arg0[%c0_45, %c68] : memref<8x324xf32, #tpu.memory_space<vmem>>, vector<8x256xf32>
    %cst_46 = arith.constant 0.000000e+00 : f32
    %81 = vector.broadcast %cst_46 : f32 to vector<8x256xf32>
    %82 = arith.maximumf %80, %81 : vector<8x256xf32>
    %c2_47 = arith.constant 2 : index
    %c0_48 = arith.constant 0 : index
    %83 = vector.load %arg2[%c2_47, %c0_48] : memref<3x256xf32, #tpu.memory_space<vmem>>, vector<1x256xf32>
    %84 = vector.broadcast %83 : vector<1x256xf32> to vector<8x256xf32>
    %85 = arith.mulf %82, %84 : vector<8x256xf32>
    %c8 = arith.constant 8 : index
    %c0_49 = arith.constant 0 : index
    %c0_50 = arith.constant 0 : index
    %86 = vector.load %arg1[%c8, %c0_49, %c0_50] : memref<9x8x1xf32, #tpu.memory_space<vmem>>, vector<1x8x1xf32>
    %87 = vector.shape_cast %86 : vector<1x8x1xf32> to vector<8x1xf32>
    %88 = vector.broadcast %87 : vector<8x1xf32> to vector<8x256xf32>
    %89 = arith.mulf %85, %88 : vector<8x256xf32>
    %90 = arith.addf %79, %89 : vector<8x256xf32>
    %c0_51 = arith.constant 0 : index
    %c0_52 = arith.constant 0 : index
    %91 = vector.load %arg3[%c0_51, %c0_52] : memref<16x8xf32, #tpu.memory_space<vmem>>, vector<16x8xf32>
    %cst_53 = arith.constant dense<0.000000e+00> : vector<16x256xf32>
    %92 = tpu.matmul %91, %90, %cst_53 {dimension_numbers = #tpu.dot_dimension_numbers<[1], [0], [0], [1], [0, 0, 1, 1], [], []>} : vector<16x8xf32>, vector<8x256xf32>, vector<16x256xf32> -> vector<16x256xf32>
    %cst_54 = arith.constant dense<0.000000e+00> : vector<16xf32>
    %93 = vector.multi_reduction <add>, %92, %cst_54 [1] : vector<16x256xf32> to vector<16xf32>
    %94 = vector.shape_cast %93 : vector<16xf32> to vector<16x1xf32>
    %95 = vector.extract_strided_slice %94 {offsets = [0, 0], sizes = [8, 1], strides = [1, 1]} : vector<16x1xf32> to vector<8x1xf32>
    %96 = vector.extract_strided_slice %94 {offsets = [8, 0], sizes = [8, 1], strides = [1, 1]} : vector<16x1xf32> to vector<8x1xf32>
    %97 = arith.addf %95, %96 : vector<8x1xf32>
    %cst_55 = arith.constant 0.001953125 : f32
    %98 = vector.broadcast %cst_55 : f32 to vector<8x1xf32>
    %99 = arith.mulf %97, %98 : vector<8x1xf32>
    %100 = vector.extract_strided_slice %92 {offsets = [0, 0], sizes = [8, 256], strides = [1, 1]} : vector<16x256xf32> to vector<8x256xf32>
    %101 = vector.broadcast %99 : vector<8x1xf32> to vector<8x256xf32>
    %102 = arith.subf %100, %101 : vector<8x256xf32>
    %103 = vector.extract_strided_slice %92 {offsets = [8, 0], sizes = [8, 256], strides = [1, 1]} : vector<16x256xf32> to vector<8x256xf32>
    %104 = vector.broadcast %99 : vector<8x1xf32> to vector<8x256xf32>
    %105 = arith.subf %103, %104 : vector<8x256xf32>
    %106 = arith.mulf %102, %102 : vector<8x256xf32>
    %cst_56 = arith.constant dense<0.000000e+00> : vector<8xf32>
    %107 = vector.multi_reduction <add>, %106, %cst_56 [1] : vector<8x256xf32> to vector<8xf32>
    %108 = vector.shape_cast %107 : vector<8xf32> to vector<8x1xf32>
    %109 = arith.mulf %105, %105 : vector<8x256xf32>
    %cst_57 = arith.constant dense<0.000000e+00> : vector<8xf32>
    %110 = vector.multi_reduction <add>, %109, %cst_57 [1] : vector<8x256xf32> to vector<8xf32>
    %111 = vector.shape_cast %110 : vector<8xf32> to vector<8x1xf32>
    %112 = arith.addf %108, %111 : vector<8x1xf32>
    %cst_58 = arith.constant 0.001953125 : f32
    %113 = vector.broadcast %cst_58 : f32 to vector<8x1xf32>
    %114 = arith.mulf %112, %113 : vector<8x1xf32>
    %c0_59 = arith.constant 0 : index
    %c0_60 = arith.constant 0 : index
    %115 = vector.load %arg4[%c0_59, %c0_60] : memref<8x1xf32, #tpu.memory_space<vmem>>, vector<8x1xf32>
    %cst_61 = arith.constant 9.99999974E-6 : f32
    %116 = vector.broadcast %cst_61 : f32 to vector<8x1xf32>
    %117 = arith.addf %114, %116 : vector<8x1xf32>
    %118 = math.rsqrt %117 : vector<8x1xf32>
    %119 = arith.mulf %115, %118 : vector<8x1xf32>
    %c0_62 = arith.constant 0 : index
    %c0_63 = arith.constant 0 : index
    %120 = vector.load %arg5[%c0_62, %c0_63] : memref<8x1xf32, #tpu.memory_space<vmem>>, vector<8x1xf32>
    %121 = vector.broadcast %119 : vector<8x1xf32> to vector<8x256xf32>
    %122 = arith.mulf %102, %121 : vector<8x256xf32>
    %123 = vector.broadcast %120 : vector<8x1xf32> to vector<8x256xf32>
    %124 = arith.addf %122, %123 : vector<8x256xf32>
    %c0_64 = arith.constant 0 : index
    %c0_65 = arith.constant 0 : index
    %125 = vector.load %arg6[%c0_64, %c0_65] : memref<16x256xf32, #tpu.memory_space<vmem>>, vector<8x256xf32>
    tpu.vector_store %arg6[%c0_64, %c0_65], %124 {strides = array<i32>} : memref<16x256xf32, #tpu.memory_space<vmem>>, vector<8x256xf32>,
    %126 = vector.broadcast %119 : vector<8x1xf32> to vector<8x256xf32>
    %127 = arith.mulf %105, %126 : vector<8x256xf32>
    %128 = vector.broadcast %120 : vector<8x1xf32> to vector<8x256xf32>
    %129 = arith.addf %127, %128 : vector<8x256xf32>
    %c8_66 = arith.constant 8 : index
    %c0_67 = arith.constant 0 : index
    %130 = vector.load %arg6[%c8_66, %c0_67] : memref<16x256xf32, #tpu.memory_space<vmem>>, vector<8x256xf32>
    tpu.vector_store %arg6[%c8_66, %c0_67], %129 {strides = array<i32>} : memref<16x256xf32, #tpu.memory_space<vmem>>, vector<8x256xf32>,
    return
  }
}

</mosaic_0001>

<bundles_post_ra>
// kernel: tpu_custom_call.1
= control target key start
LH: loop header
LB: loop body
LE: loop exit
PB: predicated region body
PF: predicated region fallthrough
CT: control target
= control target key end

     0   :  { %v30_v2 = vlaneseq  ;;  %v547_v3 = vmov 0   ;;  %s725_s0 = inlined_call_operand.vmem [shape: f32[8,324], index: 0, kind: input, shape index: {}]   ;;  %s726_s1 = inlined_call_operand.vmem [shape: f32[9,8,1], index: 1, kind: input, shape index: {}]   ;;  %s727_s2 = inlined_call_operand.vmem [shape: f32[3,256], index: 2, kind: input, shape index: {}]   ;;  %s728_s3 = inlined_call_operand.vmem [shape: f32[16,8], index: 3, kind: input, shape index: {}]   ;;  %s729_s4 = inlined_call_operand.vmem [shape: f32[8,1], index: 4, kind: input, shape index: {}]   ;;  %s730_s5 = inlined_call_operand.vmem [shape: f32[8,1], index: 5, kind: input, shape index: {}]   ;;  %s731_s6 = inlined_call_operand.hbm [shape: f32[16,256], index: 6, kind: output, shape index: {}]  }
   0x1   :  { %v492_v0 = vld [vmem:[%s726_s1 + $0x18] sm:$0xff]  ;;  %v489_v1 = vld [vmem:[%s726_s1 + $0x8] sm:$0xff]  ;;  %520 = vset.pattern.permute.xlu1 %v547_v3  ;;  %519 = vset.pattern.permute.xlu0 %v547_v3  ;;  %v493_v5 = vld [vmem:[%s726_s1 + $0x20] sm:$0xff] }
   0x2   :  { %149 = vperm.xlu1 %520, %v492_v0   ;;  %62 = vperm.xlu0 %519, %v489_v1   ;;  %v31_v4 = vshrl.u32 %v30_v2, 7  ;;  %v491_v6 = vld [vmem:[%s726_s1 + $0x10] sm:$0xff]  ;;  %v490_v7 = vld [vmem:[%s727_s2 + $0x2] ss:$4 sm:$0x3] }
   0x4   :  { %v36_v8 = vsub.s32 1, %v31_v4  ;;  %v32_v9 = vsub.s32 0, %v31_v4 }
   0x5   :  { %11 = vsyncpa [#allocation3], 0  ;;  %v28_v12 = vld [vmem:[%s727_s2] ss:$4 sm:$0x3]  ;;  %s548_s9 = smov 4  }
   0x6   :  { %175 = vperm.xlu1 %520, %v493_v5   ;;  %111 = vperm.xlu0 %519, %v491_v6   ;;  %v94_v10 = vrot.slane %v490_v7, %v36_v8  ;;  %v90_v11 = vrot.slane %v490_v7, %v32_v9  ;;  %v617_v13 = vrot.slane %v28_v12, %v36_v8  ;;  %s549_s10 = smov 32   ;;  %v495_v15 = vld [vmem:[%s726_s1 + $0x30] sm:$0xff]  ;;  %v494_v16 = vld [vmem:[%s726_s1 + $0x28] sm:$0xff]  ;;  %s550_s2 = smov 36   ;;  %v496_v17 = vld [vmem:[%s726_s1 + $0x38] sm:$0xff]  ;;  %vm99_vm0 = vcmask 31744  }
   0x7   :  { %v619_v14 = vrot.slane %v28_v12, %v32_v9  ;;  %s551_s17 = smov 64   ;;  %v497_v18 = vld [vmem:[%s726_s1 + $0x40] sm:$0xff]  ;;  %s552_s20 = smov 68   ;;  %v53_v20 = vld [vmem:[%s725_s0 + $0x8] sm:$0xff]  ;;  %v54_v21 = vld [vmem:[%s725_s0 + $0x10] sm:$0xff]  ;;  %vm137_vm1 = vcmask 261120  }
   0x8   :  { %v42_v19 = vld [vmem:[%s726_s1] sm:$0xff]  ;;  %v648_v22 = vmax.f32 %v53_v20, 0.0  ;;  %v650_v23 = vmax.f32 %v54_v21, 0.0  ;;  %s553_s1 = smov 126   ;;  %s555_s29 = smov 96   ;;  %vm201_vm2 = vcmask 293888  }
   0x9   :  { %v52_v24 = vld [vmem:[%s725_s0] sm:$0xff]  ;;  %s554_s0 = smov 124   ;;  %s556_s30 = smov 94   ;;  %vm239_vm3 = vcmask 523264   ;;  %vm302_vm4 = vcmask 556032   ;;  %vm77_vm5 = vcmask 1031168  }
   0xa   :  { %97 = vrot.lane.b32.xlu0 %v94_v10, %s548_s9  ;;  %95 = vrot.lane.b32.xlu1 %v90_v11, %s548_s9  ;;  %v655_v27 = vmax.f32 %v52_v24, 0.0  ;;  %s557_s7 = smov 92   ;;  %s558_s8 = smov 62   ;;  %v559_v24 = vmov 0.0   ;;  %vm126_vm6 = vcmask 1014784   ;;  %vm164_vm7 = vcmask 785408  }
   0xb   :  { %409 = vmatprep.mubr.f32.mxu0 %v559_v24  ;;  %415 = vmatprep.mubr.f32.mxu1 %v559_v24  ;;  %s560_s9 = smov 60   ;;  %vm190_vm8 = vcmask 769024   ;;  %vm228_vm9 = vcmask 752640   ;;  %vm291_vm10 = vcmask 506880   ;;  %vm329_vm11 = vcmask 490496   ;;  %s561_s16 = smov [#allocation2]  }
   0xc   :  { %vm338_vm12 = vcmask 64512  }
   0xe   :  { %135 = vrot.lane.b32.xlu1 %v617_v13, %s549_s10  ;;  %133 = vrot.lane.b32.xlu0 %v619_v14, %s549_s10 }
  0x12   :  { %251 = vperm.xlu1 %520, %v495_v15   ;;  %213 = vperm.xlu0 %519, %v494_v16  }
  0x16   :  { %199 = vrot.lane.b32.xlu1 %v94_v10, %s550_s2  ;;  %197 = vrot.lane.b32.xlu0 %v90_v11, %s550_s2 }
  0x1a   :  { %235 = vrot.lane.b32.xlu1 %v619_v14, %s551_s17  ;;  %276 = vperm.xlu0 %519, %v496_v17  }
  0x1e   :  { %314 = vperm.xlu1 %520, %v497_v18   ;;  %237 = vrot.lane.b32.xlu0 %v617_v13, %s551_s17 }
  0x22   :  { %298 = vrot.lane.b32.xlu0 %v90_v11, %s552_s20  ;;  %300 = vrot.lane.b32.xlu1 %v94_v10, %s552_s20 }
  0x26   :  { %45 = vperm.xlu0 %519, %v42_v19  }
  0x81   :  { %v150_v25 = vpop.permute.xlu1 %149  ;;  %v63_v26 = vpop.permute.xlu0 %62 }
  0x82   :  { %v66_v28 = vmul.f32 %v63_v26, %v648_v22  ;;  %v67_v29 = vmul.f32 %v63_v26, %v650_v23  ;;  %v65_v32 = vmul.f32 %v63_v26, %v655_v27 }
  0x84   :  { %73 = vrot.lane.b32.xlu1 %v66_v28, %s553_s1  ;;  %75 = vrot.lane.b32.xlu0 %v67_v29, %s553_s1 }
  0x85   :  { %v176_v30 = vpop.permute.xlu1 %175  ;;  %v112_v31 = vpop.permute.xlu0 %111 }
  0x86   :  { %v179_v56 = vmul.f32 %v176_v30, %v648_v22  ;;  %v180_v57 = vmul.f32 %v176_v30, %v650_v23  ;;  %v178_v61 = vmul.f32 %v176_v30, %v655_v27 }
  0x88   :  { %71 = vrot.lane.b32.xlu1 %v65_v32, %s553_s1 }
  0x89   :  { %v98_v33 = vpop.permute.xlu0 %97  ;;  %v96_v34 = vpop.permute.xlu1 %95 }
  0x8a   :  { %v106_v35 = vmul.f32 %v98_v33, %v650_v23  ;;  %v100_v36 = vsel %vm99_vm0, %v96_v34, %v98_v33  ;;  %v104_v39 = vmul.f32 %v96_v34, %v655_v27 }
  0x8b   :  { %v105_v37 = vmul.f32 %v100_v36, %v648_v22 }
  0x8c   :  { %v116_v38 = vmul.f32 %v112_v31, %v106_v35  ;;  %v114_v45 = vmul.f32 %v112_v31, %v104_v39 }
  0x8d   :  { %v136_v40 = vpop.permute.xlu1 %135  ;;  %v134_v41 = vpop.permute.xlu0 %133  ;;  %v115_v42 = vmul.f32 %v112_v31, %v105_v37 }
  0x8e   :  { %v138_v43 = vsel %vm137_vm1, %v134_v41, %v136_v40  ;;  %124 = vrot.lane.b32.xlu1 %v116_v38, %s554_s0  ;;  %v144_v46 = vmul.f32 %v136_v40, %v650_v23  ;;  %v142_v47 = vmul.f32 %v134_v41, %v655_v27 }
  0x8f   :  { %v143_v44 = vmul.f32 %v138_v43, %v648_v22  ;;  %122 = vrot.lane.b32.xlu0 %v115_v42, %s554_s0  ;;  %v41_v43 = vmul.f32 %v648_v22, %v617_v13 }
  0x90   :  { %v154_v51 = vmul.f32 %v150_v25, %v144_v46  ;;  %v152_v52 = vmul.f32 %v150_v25, %v142_v47  ;;  %v40_v47 = vmul.f32 %v655_v27, %v619_v14 }
  0x91   :  { %v252_v48 = vpop.permute.xlu1 %251  ;;  %v214_v49 = vpop.permute.xlu0 %213  ;;  %v153_v50 = vmul.f32 %v150_v25, %v143_v44 }
  0x93   :  { %120 = vrot.lane.b32.xlu0 %v114_v45, %s554_s0  ;;  %160 = vrot.lane.b32.xlu1 %v153_v50, %s555_s29 }
  0x95   :  { %v200_v53 = vpop.permute.xlu1 %199  ;;  %v198_v54 = vpop.permute.xlu0 %197 }
  0x96   :  { %v202_v55 = vsel %vm201_vm2, %v198_v54, %v200_v53  ;;  %v208_v62 = vmul.f32 %v200_v53, %v650_v23  ;;  %v206_v63 = vmul.f32 %v198_v54, %v655_v27 }
  0x97   :  { %162 = vrot.lane.b32.xlu0 %v154_v51, %s555_s29  ;;  %158 = vrot.lane.b32.xlu1 %v152_v52, %s555_s29  ;;  %v207_v58 = vmul.f32 %v202_v55, %v648_v22 }
  0x98   :  { %v218_v3 = vmul.f32 %v214_v49, %v208_v62  ;;  %v216_v4 = vmul.f32 %v214_v49, %v206_v63 }
  0x99   :  { %v277_v59 = vpop.permute.xlu0 %276  ;;  %v236_v60 = vpop.permute.xlu1 %235  ;;  %v217_v1 = vmul.f32 %v214_v49, %v207_v58 }
  0x9a   :  { %v244_v8 = vmul.f32 %v236_v60, %v655_v27  ;;  %v280_v16 = vmul.f32 %v277_v59, %v648_v22  ;;  %v279_v18 = vmul.f32 %v277_v59, %v655_v27  ;;  %v281_v19 = vmul.f32 %v277_v59, %v650_v23 }
  0x9b   :  { %186 = vrot.lane.b32.xlu0 %v179_v56, %s556_s30  ;;  %188 = vrot.lane.b32.xlu1 %v180_v57, %s556_s30 }
  0x9c   :  { %v254_v15 = vmul.f32 %v252_v48, %v244_v8 }
  0x9d   :  { %v238_v0 = vpop.permute.xlu0 %237  ;;  %v315_v5 = vpop.permute.xlu1 %314 }
  0x9e   :  { %v240_v2 = vsel %vm239_vm3, %v236_v60, %v238_v0  ;;  %v246_v7 = vmul.f32 %v238_v0, %v650_v23 }
  0x9f   :  { %184 = vrot.lane.b32.xlu0 %v178_v61, %s556_s30  ;;  %224 = vrot.lane.b32.xlu1 %v217_v1, %s557_s7  ;;  %v245_v6 = vmul.f32 %v240_v2, %v648_v22 }
  0xa0   :  { %v256_v9 = vmul.f32 %v252_v48, %v246_v7 }
  0xa1   :  { %v255_v10 = vmul.f32 %v252_v48, %v245_v6  ;;  %v301_v11 = vpop.permute.xlu1 %300  ;;  %v299_v12 = vpop.permute.xlu0 %298 }
  0xa2   :  { %v303_v17 = vsel %vm302_vm4, %v299_v12, %v301_v11  ;;  %v309_v20 = vmul.f32 %v301_v11, %v650_v23  ;;  %v307_v26 = vmul.f32 %v299_v12, %v655_v27 }
  0xa3   :  { %226 = vrot.lane.b32.xlu0 %v218_v3, %s557_s7  ;;  %222 = vrot.lane.b32.xlu1 %v216_v4, %s557_s7  ;;  %v308_v21 = vmul.f32 %v303_v17, %v648_v22 }
  0xa4   :  { %v319_v25 = vmul.f32 %v315_v5, %v309_v20  ;;  %v317_v29 = vmul.f32 %v315_v5, %v307_v26  ;;  %v336_v26 = vld [vmem:[%s728_s3] sm:$0xff] }
  0xa5   :  { %v318_v28 = vmul.f32 %v315_v5, %v308_v21  ;;  %v46_v31 = vpop.permute.xlu0 %45 }
  0xa6   :  { %v49_v48 = vmul.f32 %v46_v31, %v41_v43  ;;  %v48_v13 = vmul.f32 %v46_v31, %v40_v47 }
  0xa7   :  { %264 = vrot.lane.b32.xlu1 %v256_v9, %s551_s17  ;;  %262 = vrot.lane.b32.xlu0 %v255_v10, %s551_s17 }
  0xab   :  { %287 = vrot.lane.b32.xlu1 %v280_v16, %s558_s8  ;;  %260 = vrot.lane.b32.xlu0 %v254_v15, %s551_s17  ;;  %s478_s17 = sshll.u32 %s561_s16, 4  ;;  %s479_s17 = int_to_ptr.vmem [resolvable:$true] %s478_s17 }
  0xac   :  { %p528_p1 = scmp.lt.s32.totalorder %s479_s17, %s479_s17 }
  0xaf   :  { %285 = vrot.lane.b32.xlu1 %v279_v18, %s558_s8  ;;  %289 = vrot.lane.b32.xlu0 %v281_v19, %s558_s8 }
  0xb3   :  { %327 = vrot.lane.b32.xlu1 %v319_v25, %s560_s9  ;;  %325 = vrot.lane.b32.xlu0 %v318_v28, %s560_s9  ;;  %v337_v28 = vld [vmem:[%s728_s3 + $0x8] sm:$0xff] }
  0xb7   :  { %323 = vrot.lane.b32.xlu0 %v317_v29, %s560_s9 }
  0xf6   :  { %v74_v30 = vpop.permute.xlu1 %73  ;;  %v76_v23 = vpop.permute.xlu0 %75 }
  0xf7   :  { %v79_v46 = vsel %vm77_vm5, %v74_v30, %v76_v23 }
  0xf8   :  { %v83_v50 = vadd.f32 %v79_v46, %v49_v48  ;;  %v450_v48 = vld [vmem:[%s730_s5] sm:$0xff] }
  0xfa   :  { %v72_v32 = vpop.permute.xlu1 %71 }
  0xfb   :  { %v78_v53 = vsel %vm77_vm5, %v72_v32, %v74_v30 }
  0xfc   :  { %v82_v57 = vadd.f32 %v78_v53, %v48_v13 }
 0x100   :  { %v125_v33 = vpop.permute.xlu1 %124 }
 0x101   :  { %v123_v34 = vpop.permute.xlu0 %122 }
 0x102   :  { %v128_v49 = vsel %vm126_vm6, %v123_v34, %v125_v33 }
 0x103   :  { %v132_v22 = vadd.f32 %v128_v49, %v83_v50 }
 0x105   :  { %v161_v35 = vpop.permute.xlu1 %160  ;;  %v121_v36 = vpop.permute.xlu0 %120 }
 0x106   :  { %v127_v55 = vsel %vm126_vm6, %v121_v36, %v123_v34 }
 0x107   :  { %v131_v61 = vadd.f32 %v127_v55, %v82_v57 }
 0x109   :  { %v159_v37 = vpop.permute.xlu1 %158  ;;  %v163_v38 = vpop.permute.xlu0 %162 }
 0x10a   :  { %v166_v54 = vsel %vm164_vm7, %v161_v35, %v163_v38  ;;  %v165_v59 = vsel %vm164_vm7, %v159_v37, %v161_v35 }
 0x10b   :  { %v170_v14 = vadd.f32 %v166_v54, %v132_v22  ;;  %v169_v1 = vadd.f32 %v165_v59, %v131_v61  ;;  %v446_v54 = vld [vmem:[%s729_s4] sm:$0xff]  ;;  %s523_s4 = scalar_lea.vmem %s479_s17, 512 }
 0x10c   :  { %p524_p0 = scmp.ne.s32.totalorder %s479_s17, %s523_s4  ;;  %p529_p2 = scmp.lt.s32.totalorder %s523_s4, %s523_s4 }
 0x10d   :  { %v189_v39 = vpop.permute.xlu1 %188  ;;  %v187_v40 = vpop.permute.xlu0 %186 }
 0x10e   :  { %v192_v56 = vsel %vm190_vm8, %v187_v40, %v189_v39  ;;  %p530_p3 = por %p529_p2, %p528_p1 }
 0x10f   :  { %v196_v62 = vadd.f32 %v192_v56, %v170_v14 }
 0x110   :  { %p531_p4 = pnand %p530_p3, %p524_p0 }
 0x111   :  { %v225_v41 = vpop.permute.xlu1 %224  ;;  %v185_v42 = vpop.permute.xlu0 %184 }
 0x112   :  { %v191_v63 = vsel %vm190_vm8, %v185_v42, %v187_v40 }
 0x113   :  { %v195_v7 = vadd.f32 %v191_v63, %v169_v1 }
 0x115   :  { %v223_v44 = vpop.permute.xlu1 %222  ;;  %v227_v45 = vpop.permute.xlu0 %226 }
 0x116   :  { %v230_v60 = vsel %vm228_vm9, %v225_v41, %v227_v45  ;;  %v229_v5 = vsel %vm228_vm9, %v223_v44, %v225_v41 }
 0x117   :  { %v234_v2 = vadd.f32 %v230_v60, %v196_v62  ;;  %v233_v10 = vadd.f32 %v229_v5, %v195_v7 }
 0x119   :  { %v265_v51 = vpop.permute.xlu1 %264  ;;  %v263_v52 = vpop.permute.xlu0 %262 }
 0x11a   :  { %v267_v0 = vsel %vm239_vm3, %v263_v52, %v265_v51 }
 0x11b   :  { %v271_v8 = vadd.f32 %v267_v0, %v234_v2 }
 0x11d   :  { %v288_v27 = vpop.permute.xlu1 %287  ;;  %v261_v58 = vpop.permute.xlu0 %260 }
 0x11e   :  { %v266_v9 = vsel %vm239_vm3, %v261_v58, %v263_v52 }
 0x11f   :  { %v270_v18 = vadd.f32 %v266_v9, %v233_v10 }
 0x121   :  { %v286_v3 = vpop.permute.xlu1 %285  ;;  %v290_v4 = vpop.permute.xlu0 %289 }
 0x122   :  { %v293_v6 = vsel %vm291_vm10, %v288_v27, %v290_v4  ;;  %v292_v16 = vsel %vm291_vm10, %v286_v3, %v288_v27 }
 0x123   :  { %v297_v11 = vadd.f32 %v293_v6, %v271_v8  ;;  %v296_v20 = vadd.f32 %v292_v16, %v270_v18 }
 0x125   :  { %v328_v12 = vpop.permute.xlu1 %327  ;;  %v326_v15 = vpop.permute.xlu0 %325 }
 0x126   :  { %v331_v17 = vsel %vm329_vm11, %v326_v15, %v328_v12 }
 0x127   :  { %v335_v19 = vadd.f32 %v331_v17, %v297_v11 }
 0x129   :  { %v324_v21 = vpop.permute.xlu0 %323  ;;  %345 = vmatprep.subr.mxu0 %v335_v19  ;;  %500 = vmatprep.subr.mxu1 %v335_v19 }
 0x12a   :  { %v330_v24 = vsel %vm329_vm11, %v324_v21, %v326_v15 }
 0x12b   :  { %v334_v25 = vadd.f32 %v330_v24, %v296_v20 }
 0x12d   :  { %346 = vmatpush1.msra.mxu0 %v334_v25  ;;  %501 = vmatpush1.msra.mxu1 %v334_v25 }
 0x12e   :  { %498 = vmatmul.mubr.msk.f32.vlgmr.msra.gmra.mrb[0].mxu0 %vm338_vm12, %v336_v26  ;;  %499 = vmatmul.mubr.msk.f32.vlgmr.msra.gmra.mrb[0].mxu1 %vm338_vm12, %v337_v28 }
 0x201   :  { %v411_v29 = vpop.f32.mrb[0].mxu0  ;;  %v417_v30 = vpop.f32.mrb[0].mxu1 }
 0x202   :  { %v413_v31 = vpop.f32.mrb[1].mxu0  ;;  %v419_v32 = vpop.f32.mrb[1].mxu1 }
 0x203   :  { %v422_v23 = vadd.f32 %v413_v31, %v411_v29  ;;  %v425_v33 = vadd.f32 %v419_v32, %v417_v30 }
 0x205   :  { %426 = vadd.xlane.f32.xlu0 %v425_v33  ;;  %423 = vadd.xlane.f32.xlu1 %v422_v23 }
 0x292   :  { %v427_v34 = vpop.xlane.xlu0 %426  ;;  %v424_v35 = vpop.xlane.xlu1 %423 }
 0x293   :  { %v428_v36 = vadd.f32 %v427_v34, %v424_v35 }
 0x295   :  { %v429_v37 = vmul.f32 0.001953125, %v428_v36 }
 0x297   :  { %v432_v38 = vsub.f32 %v417_v30, %v429_v37  ;;  %v433_v39 = vsub.f32 %v419_v32, %v429_v37  ;;  %v430_v40 = vsub.f32 %v411_v29, %v429_v37  ;;  %v431_v41 = vsub.f32 %v413_v31, %v429_v37 }
 0x299   :  { %v439_v42 = vmul.f32 %v432_v38, %v432_v38  ;;  %v440_v43 = vmul.f32 %v433_v39, %v433_v39  ;;  %v434_v44 = vmul.f32 %v430_v40, %v430_v40  ;;  %v435_v45 = vmul.f32 %v431_v41, %v431_v41 }
 0x29b   :  { %v441_v46 = vadd.f32 %v440_v43, %v439_v42  ;;  %v436_v47 = vadd.f32 %v435_v45, %v434_v44 }
 0x29d   :  { %442 = vadd.xlane.f32.xlu1 %v441_v46  ;;  %437 = vadd.xlane.f32.xlu0 %v436_v47 }
 0x2ae   :  { %460 = vperm.xlu1 %520, %v450_v48  }
 0x32a   :  { %v443_v49 = vpop.xlane.xlu1 %442  ;;  %v438_v50 = vpop.xlane.xlu0 %437 }
 0x32b   :  { %v444_v51 = vadd.f32 %v443_v49, %v438_v50 }
 0x32d   :  { %v445_v52 = vmul.f32 0.001953125, %v444_v51 }
 0x32e   :  { %v461_v58 = vpop.permute.xlu1 %460 }
 0x32f   :  { %v447_v53 = vadd.f32 1e-05, %v445_v52 }
 0x331   :  { %521 = vrsqrt.f32 %v447_v53 }
 0x33b   :  { %v522_v13 = vpop.eup %521 }
 0x33c   :  { %v449_v22 = vmul.f32 %v522_v13, %v446_v54 }
 0x33e   :  { %453 = vperm.xlu0 %519, %v449_v22  }
 0x3bd   :  { %v454_v55 = vpop.permute.xlu0 %453 }
 0x3be   :  { %v456_v56 = vmul.f32 %v454_v55, %v430_v40  ;;  %v457_v57 = vmul.f32 %v454_v55, %v431_v41  ;;  %v467_v14 = vmul.f32 %v454_v55, %v432_v38  ;;  %v468_v27 = vmul.f32 %v454_v55, %v433_v39 }
 0x3c0   :  { %v463_v59 = vadd.f32 %v461_v58, %v456_v56  ;;  %v464_v60 = vadd.f32 %v461_v58, %v457_v57  ;;  %v469_v61 = vadd.f32 %v467_v14, %v461_v58  ;;  %v470_v62 = vadd.f32 %v468_v27, %v461_v58 }
 0x3c2   :  { %465 = vst [vmem:[#allocation2] sm:$0xff] %v463_v59  ;;  %466 = vst [vmem:[#allocation2 + $0x8] sm:$0xff] %v464_v60 }
 0x3c3   :  { %471 = vst [vmem:[#allocation2 + $0x10] sm:$0xff] %v469_v61  ;;  %472 = vst [vmem:[#allocation2 + $0x18] sm:$0xff] %v470_v62 }
 0x3c4   :  { %534 = shalt.err (!%p531_p4)
}
 0x3c5   :  { %s535_s19 = scalar_lea.hbm %s731_s6, 512 }
 0x3c6   :  { %p536_p5 = scmp.ne.s32.totalorder %s731_s6, %s535_s19  ;;  %p539_p6 = scmp.lt.u32.totalorder %s535_s19, %s731_s6 }
 0x3c8   :  { %p541_p7 = pnand %p539_p6, %p536_p5 }
 0x3ca   :  { %544 = shalt.err (!%p541_p7)
}
 0x3cb   :  { %s562_s24 = smov 256   ;;  %s563_s25 = smov 16  }
 0x3cc   :  { %484 = dma.vmem_to_hbm [thread:$0]  %s479_s17, 512, %s731_s6, [#allocation3], %s562_s24, %s562_s24, %s563_s25  }
 0x3cd   :  { %545 = dma.done.wait [#allocation3], 512  }
 0x3ce   :  { %546 = vsyncadd [#allocation3], 4294966784 }
 0x3cf   :  { %488 = vsyncpa [#allocation3], 1 }

</bundles_post_ra>
